<compile_context>
chip_gen: v7x
topology: tpu7x:2x2x1
jax: 0.10.0
libtpu: 0.0.40
codegen_flags: <defaults>
</compile_context>

<pallas_src>
import functools
import math
from typing import NamedTuple

import jax
import jax.numpy as jnp
from jax import lax
from jax.experimental import pallas as pl
from jax.experimental.pallas import tpu as pltpu


def _round_up(x: int, m: int) -> int:
    return ((x + m - 1) // m) * m


def _cdiv(a: int, b: int) -> int:
    return (a + b - 1) // b


# Per-grid-step VMEM budget for the (double-buffered) tiles.  Conservative for
# every generation: v5e/v6e have 128 MiB physical VMEM, v7x only 64 MiB per TC.
_TILE_VMEM_BUDGET = 20 * 1024 * 1024


class _Plan(NamedTuple):
    K: int          # true in_features
    O: int          # true out_features
    tm_cap: int     # upper bound for the M tile
    to: int         # O tile (multiple of 128)
    tk: int         # K tile (== K when K is untiled)
    kp: int         # padded K of the prepared weight (== K when untiled)
    op: int         # padded O of the prepared weight (multiple of 128)
    tiled_k: bool   # whether K gets its own reduction grid axis
    sub: int        # sublane multiple of the compute dtype (8 f32 / 16 bf16)


def _make_plan(K: int, O: int, elem_bytes: int) -> _Plan:
    sub = max(8, 32 // elem_bytes)          # f32 -> 8, bf16 -> 16, int8 -> 32
    o128 = _round_up(O, 128)

    # Prefer keeping the full K dimension in one block: no reduction axis, no
    # accumulator scratch and -- crucially -- no padding/copy of the activation.
    for tm_cap, to_cap in ((1024, 1024), (512, 1024), (512, 512),
                           (256, 512), (256, 256)):
        to = min(to_cap, o128)
        foot = elem_bytes * (2 * tm_cap * K + 2 * K * to + 2 * tm_cap * to)
        if foot <= _TILE_VMEM_BUDGET:
            return _Plan(K, O, tm_cap, to, K, K, o128, False, sub)

    # Large in_features: tile the reduction (trailing "arbitrary" grid axis,
    # f32 VMEM accumulator, bias epilogue at the last K step).
    tm_cap, to = 512, min(512, o128)
    tk = 2048
    while tk > 128:
        foot = (elem_bytes * (2 * tm_cap * tk + 2 * tk * to + 2 * tm_cap * to)
                + 4 * tm_cap * to)
        if foot <= _TILE_VMEM_BUDGET:
            break
        tk //= 2
    # Shrink TK to the smallest lane-aligned tile with the same block count so
    # the one-time weight padding along K stays small.
    n_k = _cdiv(K, tk)
    tk = _round_up(_cdiv(K, n_k), 128)
    kp = n_k * tk
    return _Plan(K, O, tm_cap, to, tk, kp, o128, True, sub)


def prepare_igtp_linear(weight, mask_t, bias=None, *, compute_dtype=None):
    """One-time weight preparation (hoist / cache across forward calls).

    weight, mask_t: (out_features, in_features).  Returns (w_ko, bias2d, plan):
    the mask-fused weight transposed to a lane-dense (K, O) layout, cast to the
    MXU compute dtype and zero-padded to the kernel's tile grid; the f32 bias
    as a (1, Op) row; and the static tiling plan.
    """
    O, K = weight.shape
    cdt = jnp.dtype(compute_dtype) if compute_dtype is not None else jnp.dtype(weight.dtype)
    plan = _make_plan(K, O, cdt.itemsize)
    w_ko = (weight * mask_t).T.astype(cdt)                       # mask fused ONCE
    w_ko = jnp.pad(w_ko, ((0, plan.kp - K), (0, plan.op - O)))   # small, one-time
    b = jnp.zeros((O,), jnp.float32) if bias is None else bias.astype(jnp.float32)
    bias2d = jnp.pad(b.reshape(1, O), ((0, 0), (0, plan.op - O)))
    return w_ko, bias2d, plan


def _igtp_kernel(x_ref, w_ref, b_ref, o_ref):
    # x: (TM, K)  w: (K, TO)  b: (1, TO)  o: (TM, TO); f32 MXU accumulation.
    acc = jnp.dot(x_ref[...], w_ref[...], preferred_element_type=jnp.float32)
    o_ref[...] = (acc + b_ref[...]).astype(o_ref.dtype)


def _igtp_kernel_ktiled(x_ref, w_ref, b_ref, o_ref, acc_ref, *, k_total, tk):
    # Trailing "arbitrary" grid axis over K; acc_ref is an f32 VMEM accumulator.
    k = pl.program_id(2)

    @pl.when(k == 0)
    def _init():
        acc_ref[...] = jnp.zeros_like(acc_ref)

    x = x_ref[...]
    if k_total % tk != 0:
        # x is NOT padded along K; the last K block overhangs the activation.
        # Zero the overhang so it matches the zero-padded weight rows.
        col = k * tk + lax.broadcasted_iota(jnp.int32, x.shape, 1)
        x = jnp.where(col < k_total, x, jnp.zeros_like(x))
    acc_ref[...] += jnp.dot(x, w_ref[...], preferred_element_type=jnp.float32)

    @pl.when(k == pl.num_programs(2) - 1)
    def _finalize():
        o_ref[...] = (acc_ref[...] + b_ref[...]).astype(o_ref.dtype)


@functools.partial(jax.jit, static_argnames=("plan", "compute_dtype"))
def igtp_linear_forward(x, w_ko, bias2d, plan, *, compute_dtype=None):
    """x: (B, N, K) -> (B, N, O), using the prepared (w_ko, bias2d, plan)."""
    B, N, K = x.shape
    assert K == plan.K, "x feature dim does not match the prepared weight"
    O = plan.O
    out_dtype = x.dtype                      # captured BEFORE any compute cast
    out_eb = jnp.dtype(out_dtype).itemsize
    M = B * N

    if compute_dtype is not None:
        x = x.astype(compute_dtype)
    eb = jnp.dtype(x.dtype).itemsize
    x2d = x.reshape(M, K)                    # free reshape; x is never padded

    TM = min(plan.tm_cap, _round_up(M, plan.sub))
    TO = plan.to
    n_m = _cdiv(M, TM)
    n_o = _cdiv(plan.op, TO)
    # Put the axis with more blocks outermost: (a) the v7x megacore shards the
    # leading parallel axis, and (b) the operand indexed only by the outer axis
    # stays resident in VMEM across the inner loop (fetched from HBM once).
    m_outer = n_m >= n_o

    if not plan.tiled_k:
        if m_outer:     # x resident; small weight re-streamed n_m times (if n_o > 1)
            grid = (n_m, n_o)
            x_map = lambda i, j: (i, 0)
            w_map = lambda i, j: (0, j)
            o_map = lambda i, j: (i, j)
            x_factor = 1
            w_factor = n_m if n_o > 1 else 1
        else:           # weight resident; x re-streamed n_o times
            grid = (n_o, n_m)
            x_map = lambda j, i: (i, 0)
            w_map = lambda j, i: (0, j)
            o_map = lambda j, i: (i, j)
            x_factor = n_o if n_m > 1 else 1
            w_factor = 1
        in_specs = [
            pl.BlockSpec((TM, K), x_map),    # full-K activation block (no x padding)
            pl.BlockSpec((K, TO), w_map),
            pl.BlockSpec((1, TO), w_map),
        ]
        out_spec = pl.BlockSpec((TM, TO), o_map)
        kernel = _igtp_kernel
        scratch = []
        sem = ("parallel", "parallel")
        foot = eb * 2 * (TM * K + K * TO) + 2 * TM * TO * out_eb
    else:
        TK = plan.tk
        n_k = _cdiv(K, TK)
        if m_outer:
            grid = (n_m, n_o, n_k)
            x_map = lambda i, j, k: (i, k)
            w_map = lambda i, j, k: (k, j)
            b_map = lambda i, j, k: (0, j)
            o_map = lambda i, j, k: (i, j)
        else:
            grid = (n_o, n_m, n_k)
            x_map = lambda j, i, k: (i, k)
            w_map = lambda j, i, k: (k, j)
            b_map = lambda j, i, k: (0, j)
            o_map = lambda j, i, k: (i, j)
        in_specs = [
            pl.BlockSpec((TM, TK), x_map),
            pl.BlockSpec((TK, TO), w_map),
            pl.BlockSpec((1, TO), b_map),
        ]
        out_spec = pl.BlockSpec((TM, TO), o_map)
        kernel = functools.partial(_igtp_kernel_ktiled, k_total=K, tk=TK)
        scratch = [pltpu.VMEM((TM, TO), jnp.float32)]
        sem = ("parallel", "parallel", "arbitrary")
        x_factor, w_factor = n_o, n_m
        foot = eb * 2 * (TM * TK + TK * TO) + 2 * TM * TO * out_eb + 4 * TM * TO

    cost = pl.CostEstimate(
        flops=2 * M * K * plan.op,
        transcendentals=0,
        bytes_accessed=int(x_factor * M * K * eb
                           + w_factor * plan.kp * plan.op * eb
                           + M * O * out_eb + plan.op * 4),
    )
    # Explicit scoped-VMEM limit: above v5e's 16 MiB default, comfortably below
    # v7x's 64 MiB per-TC physical VMEM.
    vmem_limit = int(min(48 * 1024 * 1024, max(32 * 1024 * 1024, 2 * foot)))

    out2d = pl.pallas_call(
        kernel,
        out_shape=jax.ShapeDtypeStruct((M, O), out_dtype),
        grid_spec=pltpu.PrefetchScalarGridSpec(
            num_scalar_prefetch=0,
            grid=grid,
            in_specs=in_specs,
            out_specs=out_spec,
            scratch_shapes=scratch,
        ),
        compiler_params=pltpu.CompilerParams(
            dimension_semantics=sem,
            vmem_limit_bytes=vmem_limit,
        ),
        cost_estimate=cost,
    )(x2d, w_ko, bias2d)
    return out2d.reshape(B, N, O)


def igtp_linear(x, weight, mask_t, bias=None, *, compute_dtype=None):
    """Convenience one-shot wrapper (re-prepares the weight every call).
    For repeated calls (inference / frozen mask) prefer prepare_igtp_linear()
    once + igtp_linear_forward() per call."""
    w_ko, bias2d, plan = prepare_igtp_linear(weight, mask_t, bias,
                                             compute_dtype=compute_dtype)
    return igtp_linear_forward(x, w_ko, bias2d, plan, compute_dtype=compute_dtype)


# TODO(synk): the custom backward (grad_input / masked grad_weight / grad_bias)
# of CustomizedLinearFunction is not implemented here; forward only.

if __name__ == "__main__":
    # Small deterministic setup consistent with the module.
    B, N = 2, 8           # batch, rows per batch element
    in_features = 32      # mask.shape[0]  (K)
    out_features = 16     # mask.shape[1]  (O)

    key = jax.random.PRNGKey(0)
    k_mask, k_w, k_b, k_x = jax.random.split(key, 4)

    # mask as passed to __init__: (in_features, out_features), binary
    mask_io = (jax.random.uniform(k_mask, (in_features, out_features)) > 0.5
               ).astype(jnp.float32)
    mask_t = mask_io.T                                  # (out_features, in_features)

    stdv = 1.0 / math.sqrt(in_features)
    # init_type = 'normal'
    weight = stdv * jax.random.normal(k_w, (out_features, in_features),
                                      dtype=jnp.float32)
    weight = weight * mask_t                            # weight.data *= mask (init)
    bias = stdv * jax.random.normal(k_b, (out_features,), dtype=jnp.float32)

    x = jax.random.normal(k_x, (B, N, in_features), dtype=jnp.float32)

    # One-time weight prep (hoisted out of the per-call forward), then forward.
    w_ko, b2d, plan = prepare_igtp_linear(weight, mask_t, bias)
    out = jax.block_until_ready(igtp_linear_forward(x, w_ko, b2d, plan))

    # Pure-JAX reference check of the forward pass.
    ref = jnp.einsum("bnk,ok->bno", x, weight * mask_t) + bias[None, None, :]
    assert out.shape == (B, N, out_features)
    assert jnp.allclose(out, ref, atol=1e-5, rtol=1e-5)

    # bf16 MXU operands (f32 accumulation) -- the recommended setting on v6e/v7x.
    w_bf, b_bf, plan_bf = prepare_igtp_linear(weight, mask_t, bias,
                                              compute_dtype=jnp.bfloat16)
    out_bf = jax.block_until_ready(
        igtp_linear_forward(x, w_bf, b_bf, plan_bf, compute_dtype=jnp.bfloat16))
    assert out_bf.shape == (B, N, out_features)
    assert jnp.allclose(out_bf.astype(jnp.float32), ref, atol=5e-2, rtol=5e-2)

    print("KERNEL_OK")
</pallas_src>

<mosaic_0001>
module attributes {stable_mosaic.version = 11 : i64} {
  func.func @_igtp_kernel(%arg0: i32, %arg1: i32, %arg2: memref<16x32xf32, #tpu.memory_space<vmem>>, %arg3: memref<32x128xf32, #tpu.memory_space<vmem>>, %arg4: memref<1x128xf32, #tpu.memory_space<vmem>>, %arg5: memref<16x128xf32, #tpu.memory_space<vmem>>) attributes {dimension_semantics = [#tpu.dimension_semantics<parallel>, #tpu.dimension_semantics<parallel>], iteration_bounds = array<i64: 1, 1>, scalar_prefetch = 0 : i64, scratch_operands = 0 : i64, tpu.core_type = #tpu.core_type<tc>, window_params = [{transform_indices = @transform_0, window_bounds = array<i64: 16, 32>}, {transform_indices = @transform_1, window_bounds = array<i64: 32, 128>}, {transform_indices = @transform_2, window_bounds = array<i64: 1, 128>}, {transform_indices = @transform_3, window_bounds = array<i64: 16, 128>}]} {
    %c0 = arith.constant 0 : index
    %c0_0 = arith.constant 0 : index
    %0 = vector.load %arg2[%c0, %c0_0] : memref<16x32xf32, #tpu.memory_space<vmem>>, vector<16x32xf32>
    %c0_1 = arith.constant 0 : index
    %c0_2 = arith.constant 0 : index
    %1 = vector.load %arg3[%c0_1, %c0_2] : memref<32x128xf32, #tpu.memory_space<vmem>>, vector<32x128xf32>
    %cst = arith.constant dense<0.000000e+00> : vector<16x128xf32>
    %2 = tpu.matmul %0, %1, %cst {dimension_numbers = #tpu.dot_dimension_numbers<[1], [0], [0], [1], [0, 0, 1, 1], [], []>} : vector<16x32xf32>, vector<32x128xf32>, vector<16x128xf32> -> vector<16x128xf32>
    %c0_3 = arith.constant 0 : index
    %c0_4 = arith.constant 0 : index
    %3 = vector.load %arg4[%c0_3, %c0_4] : memref<1x128xf32, #tpu.memory_space<vmem>>, vector<1x128xf32>
    %4 = vector.broadcast %3 : vector<1x128xf32> to vector<16x128xf32>
    %5 = arith.addf %2, %4 : vector<16x128xf32>
    %c0_5 = arith.constant 0 : index
    %c0_6 = arith.constant 0 : index
    %6 = vector.load %arg5[%c0_5, %c0_6] : memref<16x128xf32, #tpu.memory_space<vmem>>, vector<16x128xf32>
    tpu.vector_store %arg5[%c0_5, %c0_6], %5 {strides = array<i32>} : memref<16x128xf32, #tpu.memory_space<vmem>>, vector<16x128xf32>,
    return
  }
  func.func @transform_0(%arg0: i32, %arg1: i32) -> (i32, i32) {
    %c0_i32 = arith.constant 0 : i32
    %c0_i32_0 = arith.constant 0 : i32
    return %arg0, %c0_i32 : i32, i32
  }
  func.func @transform_1(%arg0: i32, %arg1: i32) -> (i32, i32) {
    %c0_i32 = arith.constant 0 : i32
    %c0_i32_0 = arith.constant 0 : i32
    return %c0_i32, %arg1 : i32, i32
  }
  func.func @transform_2(%arg0: i32, %arg1: i32) -> (i32, i32) {
    %c0_i32 = arith.constant 0 : i32
    %c0_i32_0 = arith.constant 0 : i32
    return %c0_i32, %arg1 : i32, i32
  }
  func.func @transform_3(%arg0: i32, %arg1: i32) -> (i32, i32) {
    %c0_i32 = arith.constant 0 : i32
    return %arg0, %arg1 : i32, i32
  }
}

</mosaic_0001>

<bundles_post_ra>
// kernel: igtp_linear_forward.1
= control target key start
LH: loop header
LB: loop body
LE: loop exit
PB: predicated region body
PF: predicated region fallthrough
CT: control target
= control target key end

     0   :  { %8 = vsyncpa [#allocation3], 0  ;;  %s336_s0 = inlined_call_operand.hbm [shape: f32[16,32], index: 0, kind: input, shape index: {}]   ;;  %s337_s1 = inlined_call_operand.hbm [shape: f32[32,128], index: 1, kind: input, shape index: {}]   ;;  %s338_s2 = inlined_call_operand.vmem [shape: f32[1,128], index: 2, kind: input, shape index: {}]   ;;  %s339_s3 = inlined_call_operand.hbm [shape: f32[16,16], index: 3, kind: output, shape index: {}]  }
   0x1   :  { %9 = vsyncpa [#allocation6], 0 }
   0x2   :  { %10 = vsyncpa [#allocation4], 0  ;;  %s263_s12 = smov [#allocation2]   ;;  %s191_s16 = scalar_lea.hbm %s336_s0, 256 }
   0x3   :  { %s16_s13 = sshll.u32 %s263_s12, 4  ;;  %p192_p0 = scmp.ne.s32.totalorder %s336_s0, %s191_s16  ;;  %s17_s13 = int_to_ptr.vmem [resolvable:$true] %s16_s13 }
   0x4   :  { %p195_p1 = scmp.lt.u32.totalorder %s191_s16, %s336_s0 }
   0x6   :  { %p197_p2 = pnand %p195_p1, %p192_p0 }
   0x8   :  { %200 = shalt.err (!%p197_p2)
}
   0x9   :  { %s201_s21 = scalar_lea.vmem %s17_s13, 256  ;;  %p206_p4 = scmp.lt.s32.totalorder %s17_s13, %s17_s13 }
   0xa   :  { %p202_p3 = scmp.ne.s32.totalorder %s17_s13, %s201_s21  ;;  %p207_p5 = scmp.lt.s32.totalorder %s201_s21, %s201_s21 }
   0xc   :  { %p208_p6 = por %p207_p5, %p206_p4 }
   0xe   :  { %p209_p7 = pnand %p208_p6, %p202_p3 }
  0x10   :  { %212 = shalt.err (!%p209_p7)
}
  0x11   :  { %s264_s22 = smov 128   ;;  %s265_s23 = smov 8  }
  0x12   :  { %22 = dma.hbm_to_vmem [thread:$0]  %s336_s0, 256, %s17_s13, [#allocation3], %s264_s22, %s264_s22, %s265_s23  }
  0x13   :  { %s266_s26 = smov [#allocation5]   ;;  %s213_s30 = scalar_lea.hbm %s337_s1, 512 }
  0x14   :  { %s28_s27 = sshll.u32 %s266_s26, 4  ;;  %p214_p8 = scmp.ne.s32.totalorder %s337_s1, %s213_s30  ;;  %s29_s27 = int_to_ptr.vmem [resolvable:$true] %s28_s27 }
  0x15   :  { %p217_p9 = scmp.lt.u32.totalorder %s213_s30, %s337_s1 }
  0x17   :  { %p219_p10 = pnand %p217_p9, %p214_p8 }
  0x19   :  { %222 = shalt.err (!%p219_p10)
}
  0x1a   :  { %s223_s8 = scalar_lea.vmem %s29_s27, 512  ;;  %p228_p12 = scmp.lt.s32.totalorder %s29_s27, %s29_s27 }
  0x1b   :  { %p224_p11 = scmp.ne.s32.totalorder %s29_s27, %s223_s8  ;;  %p229_p13 = scmp.lt.s32.totalorder %s223_s8, %s223_s8 }
  0x1d   :  { %p230_p0 = por %p229_p13, %p228_p12 }
  0x1f   :  { %p231_p1 = pnand %p230_p0, %p224_p11 }
  0x21   :  { %234 = shalt.err (!%p231_p1)
}
  0x22   :  { %34 = dma.hbm_to_vmem [thread:$0]  %s337_s1, 512, %s29_s27, [#allocation6], %s264_s22, %s264_s22, %s265_s23  }
  0x23   :  { %257 = dma.done.wait [#allocation3], 256  }
  0x24   :  { %258 = vsyncadd [#allocation3], 4294967040 }
  0x25   :  { %259 = dma.done.wait [#allocation6], 512  }
  0x26   :  { %260 = vsyncadd [#allocation6], 4294966784  ;;  %vm56_vm0 = vcmask 261120   ;;  %v45_v0 = vld [vmem:[#allocation5] sm:$0xff]  ;;  %v46_v1 = vld [vmem:[#allocation5 + $0x8] sm:$0xff]  ;;  %s267_s11 = smov [#allocation7]  }
  0x27   :  { %v47_v2 = vld [vmem:[#allocation5 + $0x10] sm:$0xff]  ;;  %v178_v3 = vpack.c.bf16 %v46_v1, %v45_v0  ;;  %v48_v4 = vld [vmem:[#allocation5 + $0x18] sm:$0xff]  ;;  %s145_s12 = sshll.u32 %s267_s11, 4  ;;  %s146_s12 = int_to_ptr.vmem [resolvable:$true] %s145_s12 }
  0x28   :  { %v43_v5 = vld [vmem:[#allocation2] sm:$0xff]  ;;  %v182_v6 = vpack.c.bf16 %v48_v4, %v47_v2  ;;  %v44_v7 = vld [vmem:[#allocation2 + $0x8] sm:$0xff]  ;;  %s235_s13 = scalar_lea.vmem %s146_s12, 256  ;;  %p240_p3 = scmp.lt.s32.totalorder %s146_s12, %s146_s12 }
  0x29   :  { %175 = vmatprep.mubr.msk.f32.mxu0 %vm56_vm0, %v43_v5  ;;  %179 = vmatprep.subr.bf16.mxu0 %v178_v3  ;;  %v158_v8 = vld [vmem:[%s338_s2] ss:$0 sm:$0xff]  ;;  %p236_p2 = scmp.ne.s32.totalorder %s146_s12, %s235_s13  ;;  %p241_p4 = scmp.lt.s32.totalorder %s235_s13, %s235_s13 }
  0x2a   :  { %181 = vmatpush3.bf16.msra.mxu0 %v178_v3 }
  0x2b   :  { %183 = vmatprep.subr.bf16.mxu0 %v182_v6  ;;  %p242_p5 = por %p241_p4, %p240_p3 }
  0x2d   :  { %p243_p6 = pnand %p242_p5, %p236_p2 }
  0x2e   :  { %185 = vmatpush3.bf16.msra.mxu0 %v182_v6 }
  0x31   :  { %176 = vmatmul.mubr.msk.f32.vlgmr.msra.gmra.mrb[0].mxu0 %vm56_vm0, %v44_v7 }
 0x104   :  { %v177_v9 = vpop.f32.mrb[0].mxu0 }
 0x105   :  { %v135_v10 = vadd.f32 %v177_v9, %v158_v8  ;;  %v129_v11 = vpop.f32.mrb[1].mxu0 }
 0x106   :  { %v130_v12 = vadd.f32 %v158_v8, %v129_v11 }
 0x107   :  { %139 = vst [vmem:[#allocation7 + $0x8] sm:$0xff] %v135_v10 }
 0x108   :  { %138 = vst [vmem:[#allocation7] sm:$0xff] %v130_v12 }
 0x109   :  { %246 = shalt.err (!%p243_p6)
}
 0x10a   :  { %s247_s2 = scalar_lea.hbm %s339_s3, 256 }
 0x10b   :  { %p248_p7 = scmp.ne.s32.totalorder %s339_s3, %s247_s2  ;;  %p251_p8 = scmp.lt.u32.totalorder %s247_s2, %s339_s3 }
 0x10d   :  { %p253_p9 = pnand %p251_p8, %p248_p7 }
 0x10f   :  { %256 = shalt.err (!%p253_p9)
}
 0x110   :  { %151 = dma.vmem_to_hbm [thread:$0]  %s146_s12, 256, %s339_s3, [#allocation4], %s264_s22, %s264_s22, %s265_s23  }
 0x111   :  { %261 = dma.done.wait [#allocation4], 256  }
 0x112   :  { %262 = vsyncadd [#allocation4], 4294967040 }
 0x113   :  { %155 = vsyncpa [#allocation3], 1 }
 0x114   :  { %156 = vsyncpa [#allocation6], 1 }
 0x115   :  { %157 = vsyncpa [#allocation4], 1 }

</bundles_post_ra>
